<compile_context>
chip_gen: v5e
topology: v5e:2x2
jax: 0.10.0
libtpu: 0.0.40
codegen_flags: <defaults>
</compile_context>

<pallas_src>
import functools

import jax
import jax.numpy as jnp
from jax.experimental import pallas as pl
from jax.experimental.pallas import tpu as pltpu


def _conv_stats_kernel(w_ref, p_ref, y_ref, sum_ref, sq_ref):
    """3x3x3 'same' conv for one (batch, spatial-tile) block as a single K=27*Cin matmul,
    plus per-block partial channel sums / sums-of-squares for BatchNorm."""
    # (Cout, K) bf16 x (K, ts) bf16 -> (Cout, ts) with f32 accumulation on the MXU.
    acc = jnp.dot(w_ref[...], p_ref[...], preferred_element_type=jnp.float32)
    sum_ref[...] = jnp.sum(acc, axis=1, keepdims=True)      # (Cout, 1) f32 partial stats
    sq_ref[...] = jnp.sum(acc * acc, axis=1, keepdims=True)
    y_ref[...] = acc                                         # lane-dense (Cout, ts) f32 store


def _bn_relu_kernel(y_ref, scale_ref, shift_ref, o_ref):
    """Folded BatchNorm (per-channel affine) + ReLU on a lane-dense (Cout, ts) block."""
    o_ref[...] = jnp.maximum(y_ref[...] * scale_ref[...] + shift_ref[...], 0.0)


def _pick_spatial_tile(S, K, cout, budget_bytes=8 << 20):
    """Largest divisor of S that is a multiple of 128 (lane-dense) whose per-step VMEM working
    set fits `budget_bytes`; falls back to the full spatial extent when S is not 128-aligned."""
    if S % 128 != 0:
        return S

    def est(ts):
        # double-buffered patches block (bf16) + y/out blocks + f32 accumulator
        return 2 * K * ts * 2 + 3 * cout * ts * 4

    cands = [ts for ts in range(128, S + 1, 128) if S % ts == 0]
    fitting = [ts for ts in cands if est(ts) <= budget_bytes]
    return max(fitting) if fitting else min(cands)


def conv_block_forward(x_ncdhw, weight_oidhw, gamma, beta, eps=1e-5, spatial_tile=None):
    """Pallas implementation of convBlock.forward. Input/weight in PyTorch layout."""
    N, Cin, D, H, W = x_ncdhw.shape
    Cout, _, KS, _, _ = weight_oidhw.shape
    pad = (KS - 1) // 2
    K = KS * KS * KS * Cin
    S = D * H * W

    ts = spatial_tile if spatial_tile is not None else _pick_spatial_tile(S, K, Cout)
    if S % ts != 0 or (ts != S and ts % 128 != 0):
        raise ValueError(f"invalid spatial_tile={ts} for D*H*W={S}")
    nt = S // ts

    # ---- wrapper-side layout plumbing (bf16 is a conscious precision choice; the matmul
    # ---- accumulates in f32 in-kernel). ----
    xb = x_ncdhw.astype(jnp.bfloat16)
    xp = jnp.pad(xb, ((0, 0), (0, 0), (pad, pad), (pad, pad), (pad, pad)))
    taps = []
    for kd in range(KS):
        for kh in range(KS):
            for kw in range(KS):
                taps.append(xp[:, :, kd:kd + D, kh:kh + H, kw:kw + W].reshape(N, Cin, S))
    patches = jnp.concatenate(taps, axis=1)                               # (N, K, S), K=(kd,kh,kw,c)
    # Weight: (O,I,KD,KH,KW) -> (Cout, KD*KH*KW*Cin), matching the patches K ordering.
    w2 = jnp.transpose(weight_oidhw, (0, 2, 3, 4, 1)).reshape(Cout, K).astype(jnp.bfloat16)

    y, psum, psq = pl.pallas_call(
        _conv_stats_kernel,
        out_shape=(
            jax.ShapeDtypeStruct((N, Cout, S), jnp.float32),      # conv activations
            jax.ShapeDtypeStruct((N, nt, Cout, 1), jnp.float32),  # partial sums
            jax.ShapeDtypeStruct((N, nt, Cout, 1), jnp.float32),  # partial sums of squares
        ),
        grid=(N, nt),
        in_specs=[
            pl.BlockSpec((Cout, K), lambda n, t: (0, 0)),          # tiny resident weight
            pl.BlockSpec((None, K, ts), lambda n, t: (n, 0, t)),   # patches block
        ],
        out_specs=(
            pl.BlockSpec((None, Cout, ts), lambda n, t: (n, 0, t)),
            pl.BlockSpec((None, None, Cout, 1), lambda n, t: (n, t, 0, 0)),
            pl.BlockSpec((None, None, Cout, 1), lambda n, t: (n, t, 0, 0)),
        ),
        compiler_params=pltpu.CompilerParams(
            dimension_semantics=("parallel", "parallel")),
    )(w2, patches)

    # Tiny per-channel reduction + BN affine fold, hoisted out of the kernels (plain JAX).
    count = jnp.float32(N * S)
    mean = jnp.sum(psum, axis=(0, 1, 3)) / count                      # (Cout,)
    var = jnp.sum(psq, axis=(0, 1, 3)) / count - mean * mean          # biased (training-mode BN)
    inv_std = jax.lax.rsqrt(var + jnp.float32(eps))
    g = gamma.astype(jnp.float32)
    scale = (g * inv_std).reshape(Cout, 1)
    shift = (beta.astype(jnp.float32) - mean * g * inv_std).reshape(Cout, 1)

    out = pl.pallas_call(
        _bn_relu_kernel,
        out_shape=jax.ShapeDtypeStruct((N, Cout, S), jnp.float32),
        grid=(N, nt),
        in_specs=[
            pl.BlockSpec((None, Cout, ts), lambda n, t: (n, 0, t)),
            pl.BlockSpec((Cout, 1), lambda n, t: (0, 0)),
            pl.BlockSpec((Cout, 1), lambda n, t: (0, 0)),
        ],
        out_specs=pl.BlockSpec((None, Cout, ts), lambda n, t: (n, 0, t)),
        compiler_params=pltpu.CompilerParams(
            dimension_semantics=("parallel", "parallel")),
    )(y, scale, shift)

    # (N, Cout, D*H*W) is already NCDHW up to a free reshape — no output transpose needed.
    return out.reshape(N, Cout, D, H, W)


def _reference_forward(x, weight, gamma, beta, eps=1e-5):
    """Pure-JAX f32 reference (training-mode BatchNorm), used only for verification."""
    y = jax.lax.conv_general_dilated(
        x, weight, window_strides=(1, 1, 1),
        padding=((1, 1), (1, 1), (1, 1)),
        dimension_numbers=("NCDHW", "OIDHW", "NCDHW"),
        precision=jax.lax.Precision.HIGHEST)
    mean = jnp.mean(y, axis=(0, 2, 3, 4), keepdims=True)
    var = jnp.var(y, axis=(0, 2, 3, 4), keepdims=True)
    yhat = (y - mean) * jax.lax.rsqrt(var + eps)
    out = yhat * gamma.reshape(1, -1, 1, 1, 1) + beta.reshape(1, -1, 1, 1, 1)
    return jnp.maximum(out, 0.0)


if __name__ == "__main__":
    N, Cin, Cout = 2, 4, 8
    D = H = W = 8

    key = jax.random.PRNGKey(0)
    kx, kw = jax.random.split(key)
    x = jax.random.normal(kx, (N, Cin, D, H, W), jnp.float32)
    # Conv3d weight shape (out, in, kD, kH, kW); deterministic synthetic init.
    weight = 0.1 * jax.random.normal(kw, (Cout, Cin, 3, 3, 3), jnp.float32)
    gamma = jnp.ones((Cout,), jnp.float32)   # BatchNorm3d default affine init
    beta = jnp.zeros((Cout,), jnp.float32)

    # spatial_tile=256 -> two spatial tiles per batch element, exercising the tiled path and
    # the per-(batch, tile) partial-stat reduction.
    fwd = jax.jit(functools.partial(conv_block_forward, spatial_tile=256))
    out = jax.block_until_ready(fwd(x, weight, gamma, beta))

    ref = _reference_forward(x, weight, gamma, beta)
    max_err = float(jnp.max(jnp.abs(out - ref)))
    # Tolerance accounts for the deliberate bf16 inputs vs the f32 HIGHEST-precision reference;
    # real bugs (tap/K misordering, wrong stats) produce O(1) errors.
    if out.shape != (N, Cout, D, H, W) or not bool(jnp.isfinite(out).all()) or max_err > 5e-2:
        raise RuntimeError(f"mismatch: shape={out.shape}, max_err={max_err}")

    print("KERNEL_OK")
</pallas_src>

<mosaic_0001>
module attributes {stable_mosaic.version = 11 : i64} {
  func.func @_conv_stats_kernel(%arg0: i32, %arg1: i32, %arg2: memref<8x108xbf16, #tpu.memory_space<vmem>>, %arg3: memref<1x108x256xbf16, #tpu.memory_space<vmem>>, %arg4: memref<1x8x256xf32, #tpu.memory_space<vmem>>, %arg5: memref<1x1x8x1xf32, #tpu.memory_space<vmem>>, %arg6: memref<1x1x8x1xf32, #tpu.memory_space<vmem>>) attributes {dimension_semantics = [#tpu.dimension_semantics<parallel>, #tpu.dimension_semantics<parallel>], iteration_bounds = array<i64: 2, 2>, scalar_prefetch = 0 : i64, scratch_operands = 0 : i64, tpu.core_type = #tpu.core_type<tc>, window_params = [{pipeline_mode = #tpu.pipeline_mode<synchronous>, transform_indices = @transform_0, window_bounds = array<i64: 8, 108>}, {transform_indices = @transform_1, window_bounds = array<i64: 1, 108, 256>}, {transform_indices = @transform_2, window_bounds = array<i64: 1, 8, 256>}, {transform_indices = @transform_3, window_bounds = array<i64: 1, 1, 8, 1>}, {transform_indices = @transform_4, window_bounds = array<i64: 1, 1, 8, 1>}]} {
    %c0 = arith.constant 0 : index
    %c0_0 = arith.constant 0 : index
    %0 = vector.load %arg2[%c0, %c0_0] : memref<8x108xbf16, #tpu.memory_space<vmem>>, vector<8x108xbf16>
    %c0_1 = arith.constant 0 : index
    %c0_2 = arith.constant 0 : index
    %c0_3 = arith.constant 0 : index
    %1 = vector.load %arg3[%c0_1, %c0_2, %c0_3] : memref<1x108x256xbf16, #tpu.memory_space<vmem>>, vector<1x108x256xbf16>
    %2 = vector.shape_cast %1 : vector<1x108x256xbf16> to vector<108x256xbf16>
    %cst = arith.constant dense<0.000000e+00> : vector<8x256xf32>
    %3 = tpu.matmul %0, %2, %cst {dimension_numbers = #tpu.dot_dimension_numbers<[1], [0], [0], [1], [0, 0, 1, 1], [], []>} : vector<8x108xbf16>, vector<108x256xbf16>, vector<8x256xf32> -> vector<8x256xf32>
    %cst_4 = arith.constant dense<0.000000e+00> : vector<8xf32>
    %4 = vector.multi_reduction <add>, %3, %cst_4 [1] : vector<8x256xf32> to vector<8xf32>
    %5 = vector.shape_cast %4 : vector<8xf32> to vector<8x1xf32>
    %c0_5 = arith.constant 0 : index
    %c0_6 = arith.constant 0 : index
    %c0_7 = arith.constant 0 : index
    %c0_8 = arith.constant 0 : index
    %6 = vector.load %arg5[%c0_5, %c0_6, %c0_7, %c0_8] : memref<1x1x8x1xf32, #tpu.memory_space<vmem>>, vector<1x1x8x1xf32>
    %7 = vector.shape_cast %6 : vector<1x1x8x1xf32> to vector<8x1xf32>
    %8 = vector.shape_cast %5 : vector<8x1xf32> to vector<1x1x8x1xf32>
    tpu.vector_store %arg5[%c0_5, %c0_6, %c0_7, %c0_8], %8 {strides = array<i32>} : memref<1x1x8x1xf32, #tpu.memory_space<vmem>>, vector<1x1x8x1xf32>,
    %9 = arith.mulf %3, %3 : vector<8x256xf32>
    %cst_9 = arith.constant dense<0.000000e+00> : vector<8xf32>
    %10 = vector.multi_reduction <add>, %9, %cst_9 [1] : vector<8x256xf32> to vector<8xf32>
    %11 = vector.shape_cast %10 : vector<8xf32> to vector<8x1xf32>
    %c0_10 = arith.constant 0 : index
    %c0_11 = arith.constant 0 : index
    %c0_12 = arith.constant 0 : index
    %c0_13 = arith.constant 0 : index
    %12 = vector.load %arg6[%c0_10, %c0_11, %c0_12, %c0_13] : memref<1x1x8x1xf32, #tpu.memory_space<vmem>>, vector<1x1x8x1xf32>
    %13 = vector.shape_cast %12 : vector<1x1x8x1xf32> to vector<8x1xf32>
    %14 = vector.shape_cast %11 : vector<8x1xf32> to vector<1x1x8x1xf32>
    tpu.vector_store %arg6[%c0_10, %c0_11, %c0_12, %c0_13], %14 {strides = array<i32>} : memref<1x1x8x1xf32, #tpu.memory_space<vmem>>, vector<1x1x8x1xf32>,
    %c0_14 = arith.constant 0 : index
    %c0_15 = arith.constant 0 : index
    %c0_16 = arith.constant 0 : index
    %15 = vector.load %arg4[%c0_14, %c0_15, %c0_16] : memref<1x8x256xf32, #tpu.memory_space<vmem>>, vector<1x8x256xf32>
    %16 = vector.shape_cast %15 : vector<1x8x256xf32> to vector<8x256xf32>
    %17 = vector.shape_cast %3 : vector<8x256xf32> to vector<1x8x256xf32>
    tpu.vector_store %arg4[%c0_14, %c0_15, %c0_16], %17 {strides = array<i32>} : memref<1x8x256xf32, #tpu.memory_space<vmem>>, vector<1x8x256xf32>,
    return
  }
  func.func @transform_0(%arg0: i32, %arg1: i32) -> (i32, i32) {
    %c0_i32 = arith.constant 0 : i32
    %c0_i32_0 = arith.constant 0 : i32
    %c0_i32_1 = arith.constant 0 : i32
    return %c0_i32, %c0_i32_0 : i32, i32
  }
  func.func @transform_1(%arg0: i32, %arg1: i32) -> (i32, i32, i32) {
    %c0_i32 = arith.constant 0 : i32
    %c0_i32_0 = arith.constant 0 : i32
    return %arg0, %c0_i32, %arg1 : i32, i32, i32
  }
  func.func @transform_2(%arg0: i32, %arg1: i32) -> (i32, i32, i32) {
    %c0_i32 = arith.constant 0 : i32
    %c0_i32_0 = arith.constant 0 : i32
    return %arg0, %c0_i32, %arg1 : i32, i32, i32
  }
  func.func @transform_3(%arg0: i32, %arg1: i32) -> (i32, i32, i32, i32) {
    %c0_i32 = arith.constant 0 : i32
    %c0_i32_0 = arith.constant 0 : i32
    %c0_i32_1 = arith.constant 0 : i32
    return %arg0, %arg1, %c0_i32, %c0_i32_0 : i32, i32, i32, i32
  }
  func.func @transform_4(%arg0: i32, %arg1: i32) -> (i32, i32, i32, i32) {
    %c0_i32 = arith.constant 0 : i32
    %c0_i32_0 = arith.constant 0 : i32
    %c0_i32_1 = arith.constant 0 : i32
    return %arg0, %arg1, %c0_i32, %c0_i32_0 : i32, i32, i32, i32
  }
}

module attributes {stable_mosaic.version = 11 : i64} {
  func.func @_bn_relu_kernel(%arg0: i32, %arg1: i32, %arg2: memref<1x8x256xf32, #tpu.memory_space<vmem>>, %arg3: memref<8x1xf32, #tpu.memory_space<vmem>>, %arg4: memref<8x1xf32, #tpu.memory_space<vmem>>, %arg5: memref<1x8x256xf32, #tpu.memory_space<vmem>>) attributes {dimension_semantics = [#tpu.dimension_semantics<parallel>, #tpu.dimension_semantics<parallel>], iteration_bounds = array<i64: 2, 2>, scalar_prefetch = 0 : i64, scratch_operands = 0 : i64, tpu.core_type = #tpu.core_type<tc>, window_params = [{transform_indices = @transform_0, window_bounds = array<i64: 1, 8, 256>}, {pipeline_mode = #tpu.pipeline_mode<synchronous>, transform_indices = @transform_1, window_bounds = array<i64: 8, 1>}, {pipeline_mode = #tpu.pipeline_mode<synchronous>, transform_indices = @transform_2, window_bounds = array<i64: 8, 1>}, {transform_indices = @transform_3, window_bounds = array<i64: 1, 8, 256>}]} {
    %c0 = arith.constant 0 : index
    %c0_0 = arith.constant 0 : index
    %c0_1 = arith.constant 0 : index
    %0 = vector.load %arg2[%c0, %c0_0, %c0_1] : memref<1x8x256xf32, #tpu.memory_space<vmem>>, vector<1x8x256xf32>
    %1 = vector.shape_cast %0 : vector<1x8x256xf32> to vector<8x256xf32>
    %c0_2 = arith.constant 0 : index
    %c0_3 = arith.constant 0 : index
    %2 = vector.load %arg3[%c0_2, %c0_3] : memref<8x1xf32, #tpu.memory_space<vmem>>, vector<8x1xf32>
    %3 = vector.broadcast %2 : vector<8x1xf32> to vector<8x256xf32>
    %4 = arith.mulf %1, %3 : vector<8x256xf32>
    %c0_4 = arith.constant 0 : index
    %c0_5 = arith.constant 0 : index
    %5 = vector.load %arg4[%c0_4, %c0_5] : memref<8x1xf32, #tpu.memory_space<vmem>>, vector<8x1xf32>
    %6 = vector.broadcast %5 : vector<8x1xf32> to vector<8x256xf32>
    %7 = arith.addf %4, %6 : vector<8x256xf32>
    %cst = arith.constant 0.000000e+00 : f32
    %8 = vector.broadcast %cst : f32 to vector<8x256xf32>
    %9 = arith.maximumf %7, %8 : vector<8x256xf32>
    %c0_6 = arith.constant 0 : index
    %c0_7 = arith.constant 0 : index
    %c0_8 = arith.constant 0 : index
    %10 = vector.load %arg5[%c0_6, %c0_7, %c0_8] : memref<1x8x256xf32, #tpu.memory_space<vmem>>, vector<1x8x256xf32>
    %11 = vector.shape_cast %10 : vector<1x8x256xf32> to vector<8x256xf32>
    %12 = vector.shape_cast %9 : vector<8x256xf32> to vector<1x8x256xf32>
    tpu.vector_store %arg5[%c0_6, %c0_7, %c0_8], %12 {strides = array<i32>} : memref<1x8x256xf32, #tpu.memory_space<vmem>>, vector<1x8x256xf32>,
    return
  }
  func.func @transform_0(%arg0: i32, %arg1: i32) -> (i32, i32, i32) {
    %c0_i32 = arith.constant 0 : i32
    %c0_i32_0 = arith.constant 0 : i32
    return %arg0, %c0_i32, %arg1 : i32, i32, i32
  }
  func.func @transform_1(%arg0: i32, %arg1: i32) -> (i32, i32) {
    %c0_i32 = arith.constant 0 : i32
    %c0_i32_0 = arith.constant 0 : i32
    %c0_i32_1 = arith.constant 0 : i32
    return %c0_i32, %c0_i32_0 : i32, i32
  }
  func.func @transform_2(%arg0: i32, %arg1: i32) -> (i32, i32) {
    %c0_i32 = arith.constant 0 : i32
    %c0_i32_0 = arith.constant 0 : i32
    %c0_i32_1 = arith.constant 0 : i32
    return %c0_i32, %c0_i32_0 : i32, i32
  }
  func.func @transform_3(%arg0: i32, %arg1: i32) -> (i32, i32, i32) {
    %c0_i32 = arith.constant 0 : i32
    %c0_i32_0 = arith.constant 0 : i32
    return %arg0, %c0_i32, %arg1 : i32, i32, i32
  }
}

</mosaic_0001>

<bundles_post_ra>
// kernel: conv_block_forward.2
= control target key start
LH: loop header
LB: loop body
LE: loop exit
PB: predicated region body
PF: predicated region fallthrough
CT: control target
= control target key end

     0   :  { %s904_s15 = smov 0   ;;  %s906_s16 = smov 0   ;;  %s1035_s0 = inlined_call_operand.vmem [shape: bf16[8,108], index: 0, kind: input, shape index: {}]   ;;  %s1036_s1 = inlined_call_operand.vmem [shape: bf16[2,108,512], index: 1, kind: input, shape index: {}]   ;;  %s1037_s2 = inlined_call_operand.vmem [shape: f32[2,8,512], index: 2, kind: output, shape index: {0}]   ;;  %s1038_s3 = inlined_call_operand.vmem [shape: f32[2,2,8,1], index: 3, kind: output, shape index: {1}]   ;;  %s1039_s4 = inlined_call_operand.vmem [shape: f32[2,2,8,1], index: 4, kind: output, shape index: {2}]  }
   0x1   :  { %s908_s17 = smov 0   ;;  %s910_s18 = smov 0  }
   0x2   :  { %s912_s19 = smov 0   ;;  %s914_s20 = smov 0  }
   0x3   :  { %s916_s21 = smov 0  }
   0x4 LB: > { %s24_s22 = sadd.s32 1, %s869_s19  ;;  %s27_s23 = sadd.s32 1, %s873_s20  ;;  %s877_s21 = sphi %s916_s21, %s15_s21   ;;  %s873_s20 = sphi %s914_s20, %s1045_s20   ;;  %s869_s19 = sphi %s912_s19, %s1044_s19   ;;  %s865_s18 = sphi %s910_s18, %s1043_s18   ;;  %s861_s17 = sphi %s908_s17, %s1042_s17   ;;  %s857_s16 = sphi %s906_s16, %s1041_s16   ;;  %s853_s15 = sphi %s904_s15, %s1040_s15  }
   0x5   : > { %p25_p0 = scmp.ge.s32.totalorder %s24_s22, 2  ;;  %p64_p1 = scmp.ne.s32.totalorder %s857_s16, %s853_s15 }
   0x6   : > { %p65_p2 = scmp.eq.s32.totalorder %s877_s21, 0  ;;  %s57_s27 = sadd.s32 1, %s857_s16 }
   0x7   : > { %s1047_s22 = smov (%p25_p0, %s24_s22), 0  ;;  %s1049_s23 = smov (!%p25_p0, %s27_s23), %s873_s20 }
   0x8   : > { %p66_p3 = por %p65_p2, %p64_p1  ;;  %p29_p4 = scmp.ge.s32.totalorder %s1049_s23, 2 }
   0x9   : > { %s53_s24 = ssub.s32 %s869_s19, %s1047_s22  ;;  %p679_p6 = scmp.ge.s32.totalorder %s877_s21, 4 }
   0xa   : > { %s1051_s23 = smov (%p29_p4, %s1049_s23), 0 }
   0xb   : > { %s52_s25 = ssub.s32 %s873_s20, %s1051_s23  ;;  %177 = sbr.rel (%p679_p6) target bundleno = 38 (0x26), region = 20 }
   0xc   : > { %s54_s26 = sor.u32 %s53_s24, %s52_s25 }
   0xd   : > { %p55_p5 = scmp.eq.s32.totalorder %s54_s26, 0 }
   0xf   : > { %s955_s28 = scalar_select %p55_p5, %s857_s16, %s57_s27  }
  0x10   : > { %180 = sbr.rel (!%p66_p3) target bundleno = 38 (0x26), region = 24  ;;  %s182_s29 = sand.u32 (%p66_p3), 1, %s857_s16  }
  0x11   : > { %s764_s30 = smul.u32 (%p66_p3), 112, %s182_s29  ;;  %s680_s5 = sshll.u32 (%p66_p3), %s869_s19, 1 }
  0x12   : > { %s765_s6 = smul.u32 (%p66_p3), 56, %s873_s20 }
  0x13   : > { %s184_s12 = scalar_lea.vmem (%p66_p3), [#allocation2], %s764_s30 }
  0x14   : > { %s187_s7 = sadd.s32 (%p66_p3), %s765_s6, %s680_s5 }
  0x15   : > { %s681_s8 = sshll.u32 %s187_s7, 2 }
  0x16   : > { %s189_s11 = scalar_lea.vmem %s1036_s1, %s681_s8 }
  0x17   : > { %v244_v0 = vld [vmem:[%s189_s11] sm:$0xff]  ;;  %v246_v1 = vld [vmem:[%s189_s11 + $0x10] sm:$0xff] }
  0x18   : > { %v248_v2 = vld [vmem:[%s189_s11 + $0x20] sm:$0xff]  ;;  %245 = vst [vmem:[%s184_s12] sm:$0xff] %v244_v0  ;;  %v250_v3 = vld [vmem:[%s189_s11 + $0x30] sm:$0xff] }
  0x19   : > { %247 = vst [vmem:[%s184_s12 + $0x8] sm:$0xff] %v246_v1  ;;  %v252_v4 = vld [vmem:[%s189_s11 + $0x40] sm:$0xff]  ;;  %v254_v5 = vld [vmem:[%s189_s11 + $0x50] sm:$0xff] }
  0x1a   : > { %249 = vst [vmem:[%s184_s12 + $0x10] sm:$0xff] %v248_v2  ;;  %v256_v6 = vld [vmem:[%s189_s11 + $0x60] sm:$0xff]  ;;  %v258_v7 = vld [vmem:[%s189_s11 + $0x70] sm:$0xff] }
  0x1b   : > { %251 = vst [vmem:[%s184_s12 + $0x18] sm:$0xff] %v250_v3  ;;  %v260_v8 = vld [vmem:[%s189_s11 + $0x80] sm:$0xff]  ;;  %v262_v9 = vld [vmem:[%s189_s11 + $0x90] sm:$0xff] }
  0x1c   : > { %253 = vst [vmem:[%s184_s12 + $0x20] sm:$0xff] %v252_v4  ;;  %v264_v10 = vld [vmem:[%s189_s11 + $0xa0] sm:$0xff]  ;;  %v266_v11 = vld [vmem:[%s189_s11 + $0xb0] sm:$0xff] }
  0x1d   : > { %255 = vst [vmem:[%s184_s12 + $0x28] sm:$0xff] %v254_v5  ;;  %v268_v12 = vld [vmem:[%s189_s11 + $0xc0] sm:$0xff]  ;;  %v270_v13 = vld [vmem:[%s189_s11 + $0xd0] sm:$0xff] }
  0x1e   : > { %257 = vst [vmem:[%s184_s12 + $0x30] sm:$0xff] %v256_v6 }
  0x1f   : > { %259 = vst [vmem:[%s184_s12 + $0x38] sm:$0xff] %v258_v7 }
  0x20   : > { %261 = vst [vmem:[%s184_s12 + $0x40] sm:$0xff] %v260_v8 }
  0x21   : > { %263 = vst [vmem:[%s184_s12 + $0x48] sm:$0xff] %v262_v9 }
  0x22   : > { %265 = vst [vmem:[%s184_s12 + $0x50] sm:$0xff] %v264_v10 }
  0x23   : > { %267 = vst [vmem:[%s184_s12 + $0x58] sm:$0xff] %v266_v11 }
  0x24   : > { %269 = vst [vmem:[%s184_s12 + $0x60] sm:$0xff] %v268_v12 }
  0x25   : > { %271 = vst [vmem:[%s184_s12 + $0x68] sm:$0xff] %v270_v13 }
  0x26 PF: > { %p682_p7 = scmp.ge.s32.totalorder %s877_s21, 1  ;;  %p276_p8 = scmp.lt.s32.totalorder %s877_s21, 5 }
  0x28   : > { %p277_p9 = pnand %p682_p7, %p276_p8 }
  0x29   : > { %s283_s13 = sand.u32 (!%p277_p9), 1, %s853_s15   ;;  %s683_s26 = sshll.u32 (!%p277_p9), %s861_s17, 1 }
  0x2a   : > { %280 = sbr.rel (%p277_p9) target bundleno = 332 (0x14c), region = 62  ;;  %p330_p10 = scmp.lt.s32.totalorder (!%p277_p9), %s865_s18, 1 }
  0x2b   : > { %s766_s14 = smul.u32 (!%p277_p9), 112, %s283_s13  ;;  %p332_p11 = scmp.lt.s32.totalorder (!%p277_p9), %s683_s26, 3 }
  0x2c   : > { %p341_p12 = scmp.lt.s32.totalorder (!%p277_p9), %s861_s17, 1 }
  0x2d   : > { %s967_s24 = scalar_lea.vmem (!%p277_p9), [#allocation2], %s766_s14 }
  0x2f   : > { %vm443_vm0 = vcmask 1045504   ;;  %v740_v14 = vld [vmem:[%s967_s24 + $0x60] sm:$0xf]  ;;  %v763_v15 = vld [vmem:[%s967_s24 + $0x64] sm:$0x30]  ;;  %vm439_vm1 = vcmask 883712  }
  0x30   : > { %v762_v16 = vld [vmem:[%s967_s24 + $0x64] sm:$0xf]  ;;  %v741_v17 = vor.u32 %v763_v15, %v740_v14  ;;  %v742_v18 = vld [vmem:[%s967_s24 + $0x68] sm:$0x30]  ;;  %v732_v19 = vld [vmem:[%s967_s24 + $0x50] sm:$0xf] }
  0x31   : > { %v761_v20 = vld [vmem:[%s967_s24 + $0x54] sm:$0xf0]  ;;  %v745_v21 = vor.u32 %v762_v16, %v742_v18  ;;  %v760_v22 = vld [vmem:[%s967_s24 + $0x54] sm:$0xf]  ;;  %v734_v23 = vld [vmem:[%s967_s24 + $0x58] sm:$0xf0] }
  0x32   : > { %v445_v24 = vsel %vm443_vm0, %v741_v17, 0  ;;  %v733_v26 = vor.u32 %v761_v20, %v732_v19  ;;  %v737_v27 = vor.u32 %v760_v22, %v734_v23  ;;  %v724_v28 = vld [vmem:[%s967_s24 + $0x40] sm:$0xf]  ;;  %v759_v29 = vld [vmem:[%s967_s24 + $0x44] sm:$0xf0]  ;;  %s1053_s18 = smov (!%p330_p10, %s865_s18), 1 }
  0x33   : > { %451 = vmatpush.bf16.msra.mxu0 %v445_v24  ;;  %v448_v25 = vsel %vm443_vm0, %v745_v21, 0  ;;  %v758_v30 = vld [vmem:[%s967_s24 + $0x44] sm:$0xf]  ;;  %v726_v31 = vld [vmem:[%s967_s24 + $0x48] sm:$0xf0]  ;;  %v725_v32 = vor.u32 %v759_v29, %v724_v28  ;;  %s1055_s26 = smov (!%p332_p11, %s683_s26), 3 }
  0x34   : > { %464 = vmatpush.bf16.msra.mxu1 %v448_v25  ;;  %v729_v33 = vor.u32 %v758_v30, %v726_v31  ;;  %v716_v34 = vld [vmem:[%s967_s24 + $0x30] sm:$0xf]  ;;  %v757_v35 = vld [vmem:[%s967_s24 + $0x34] sm:$0xf0]  ;;  %v756_v36 = vld [vmem:[%s967_s24 + $0x34] sm:$0xf] }
  0x35   : > { %v718_v37 = vld [vmem:[%s967_s24 + $0x38] sm:$0xf0]  ;;  %v717_v38 = vor.u32 %v757_v35, %v716_v34  ;;  %v708_v40 = vld [vmem:[%s967_s24 + $0x20] sm:$0xf]  ;;  %v755_v41 = vld [vmem:[%s967_s24 + $0x24] sm:$0xf0] }
  0x36   : > { %v721_v39 = vor.u32 %v756_v36, %v718_v37  ;;  %v754_v42 = vld [vmem:[%s967_s24 + $0x24] sm:$0xf]  ;;  %v710_v43 = vld [vmem:[%s967_s24 + $0x28] sm:$0xf0]  ;;  %v709_v44 = vor.u32 %v755_v41, %v708_v40  ;;  %v700_v46 = vld [vmem:[%s967_s24 + $0x10] sm:$0xf] }
  0x37   : > { %452 = vmatpush.bf16.msra.mxu0 %v733_v26  ;;  %v713_v45 = vor.u32 %v754_v42, %v710_v43  ;;  %v753_v47 = vld [vmem:[%s967_s24 + $0x14] sm:$0xf0]  ;;  %v752_v48 = vld [vmem:[%s967_s24 + $0x14] sm:$0xf]  ;;  %v702_v49 = vld [vmem:[%s967_s24 + $0x18] sm:$0xf0] }
  0x38   : > { %465 = vmatpush.bf16.msra.mxu1 %v737_v27  ;;  %v701_v50 = vor.u32 %v753_v47, %v700_v46  ;;  %v705_v51 = vor.u32 %v752_v48, %v702_v49  ;;  %v692_v52 = vld [vmem:[%s967_s24] sm:$0xf]  ;;  %v751_v53 = vld [vmem:[%s967_s24 + $0x4] sm:$0xf0]  ;;  %v750_v54 = vld [vmem:[%s967_s24 + $0x4] sm:$0xf] }
  0x39   : > { %v694_v55 = vld [vmem:[%s967_s24 + $0x8] sm:$0xf0]  ;;  %v693_v56 = vor.u32 %v751_v53, %v692_v52  ;;  %v356_v58 = vld [vmem:[%s1035_s0] sm:$0xf]  ;;  %s684_s27 = sshll.u32 %s1053_s18, 2  ;;  %s1057_s17 = smov (!%p341_p12, %s861_s17), 1 }
  0x3a   : > { %v697_v57 = vor.u32 %v750_v54, %v694_v55  ;;  %s335_s29 = sadd.s32 %s684_s27, %s1055_s26  ;;  %s686_s8 = sshll.u32 %s1053_s18, 1  ;;  %vm479_vm2 = vcmask 7168  }
  0x3b   : > { %453 = vmatpush.bf16.msra.mxu0 %v725_v32  ;;  %s685_s30 = sshll.u32 %s335_s29, 3  ;;  %s344_s9 = sadd.s32 %s686_s8, %s1057_s17 }
  0x3c   : > { %466 = vmatpush.bf16.msra.mxu1 %v729_v33  ;;  %s337_s7 = scalar_lea.vmem %s1037_s2, %s685_s30  ;;  %s687_s10 = sshll.u32 %s344_s9, 3 }
  0x3d   : > { %s346_s13 = scalar_lea.vmem %s1038_s3, %s687_s10  ;;  %s354_s15 = scalar_lea.vmem %s1039_s4, %s687_s10 }
  0x3f   : > { %454 = vmatpush.bf16.msra.mxu0 %v717_v38 }
  0x40   : > { %467 = vmatpush.bf16.msra.mxu1 %v721_v39 }
  0x43   : > { %455 = vmatpush.bf16.msra.mxu0 %v709_v44 }
  0x44   : > { %468 = vmatpush.bf16.msra.mxu1 %v713_v45 }
  0x47   : > { %456 = vmatpush.bf16.msra.mxu0 %v701_v50 }
  0x48   : > { %469 = vmatpush.bf16.msra.mxu1 %v705_v51 }
  0x4b   : > { %457 = vmatpush.bf16.msra.mxu0 %v693_v56 }
  0x4c   : > { %470 = vmatpush.bf16.msra.mxu1 %v697_v57 }
  0x4e   : > { %746 = vmatmul.msk.bf16.vlgmr.msra.gmra.mxu0 %vm439_vm1, %v356_v58 }
  0x4f   : > { %747 = vmatmul.msk.bf16.vlgmr.msra.gmra.mxu1 %vm439_vm1, %v356_v58 }
  0xcb   : > { %v459_v59 = vpop.f32.mrf.mxu0 }
  0xcc   : > { %487 = vst [vmem:[%s337_s7] sm:$0xff] %v459_v59  ;;  %v472_v60 = vpop.f32.mrf.mxu1  ;;  %v481_v62 = vmul.f32 %v459_v59, %v459_v59 }
  0xcd   : > { %488 = vst [vmem:[%s337_s7 + $0x8] sm:$0xff] %v472_v60  ;;  %v476_v61 = vadd.f32 %v472_v60, %v459_v59  ;;  %v482_v63 = vmul.f32 %v472_v60, %v472_v60 }
  0xcf   : > { %477 = vadd.xlane.f32.xlu0 %v476_v61  ;;  %v483_v2 = vadd.f32 %v482_v63, %v481_v62 }
  0xd3   : > { %v461_v0 = vpop.f32.mrf.mxu0 }
  0xd4   : > { %v474_v1 = vpop.f32.mrf.mxu1 }
  0xd7   : > { %484 = vadd.xlane.f32.xlu0 %v483_v2 }
 0x142   : > { %v478_v3 = vpop.xlane.xlu0 %477 }
 0x143   : > { %480 = vst.msk [vmem:[%s346_s13] sm:$0xff] %vm479_vm2, %v478_v3 }
 0x14a   : > { %v485_v4 = vpop.xlane.xlu0 %484 }
 0x14b   : > { %486 = vst.msk [vmem:[%s354_s15] sm:$0xff] %vm479_vm2, %v485_v4 }
 0x14c PF: > { %s15_s21 = sadd.s32 1, %s877_s21   ;;  %s1040_s15 = smov %s857_s16 }
 0x14d   : > { %p12_p13 = scmp.ge.s32.totalorder %s15_s21, 6   ;;  %s1041_s16 = smov %s955_s28 }
 0x14e   : > { %s1042_s17 = smov %s869_s19  ;;  %s1043_s18 = smov %s873_s20 }
 0x14f   : > { %s1044_s19 = smov %s1047_s22  ;;  %s1045_s20 = smov %s1051_s23 }
 0x150   :  { %14 = sbr.rel (!%p12_p13) target bundleno = 4 (0x4), region = 125 }

// kernel: conv_block_forward.3
= control target key start
LH: loop header
LB: loop body
LE: loop exit
PB: predicated region body
PF: predicated region fallthrough
CT: control target
= control target key end

     0   :  { %s438_s12 = smov 0   ;;  %s440_s13 = smov 0   ;;  %s495_s0 = inlined_call_operand.vmem [shape: f32[2,8,512], index: 0, kind: input, shape index: {}]   ;;  %s496_s1 = inlined_call_operand.vmem [shape: f32[8,1], index: 1, kind: input, shape index: {}]   ;;  %s497_s2 = inlined_call_operand.vmem [shape: f32[8,1], index: 2, kind: input, shape index: {}]   ;;  %s498_s3 = inlined_call_operand.vmem [shape: f32[2,8,512], index: 3, kind: output, shape index: {}]  }
   0x1   :  { %s442_s14 = smov 0   ;;  %s444_s15 = smov 0  }
   0x2   :  { %s446_s16 = smov 0  }
   0x3 LB: > { %s22_s17 = sadd.s32 1, %s407_s14  ;;  %s25_s18 = sadd.s32 1, %s411_s15  ;;  %s415_s16 = sphi %s446_s16, %s13_s16   ;;  %s411_s15 = sphi %s444_s15, %s502_s15   ;;  %s407_s14 = sphi %s442_s14, %s501_s14   ;;  %s403_s13 = sphi %s440_s13, %s500_s13   ;;  %s399_s12 = sphi %s438_s12, %s499_s12  }
   0x4   : > { %p23_p0 = scmp.ge.s32.totalorder %s22_s17, 2  ;;  %p326_p1 = scmp.ge.s32.totalorder %s415_s16, 1 }
   0x5   : > { %p158_p2 = scmp.lt.s32.totalorder %s415_s16, 5 }
   0x6   : > { %s504_s17 = smov (%p23_p0, %s22_s17), 0  ;;  %s506_s18 = smov (!%p23_p0, %s25_s18), %s411_s15 }
   0x7   : > { %p159_p3 = pnand %p326_p1, %p158_p2  ;;  %p27_p4 = scmp.ge.s32.totalorder %s506_s18, 2 }
   0x8   : > { %s327_s23 = sshll.u32 (!%p159_p3), %s399_s12, 1  ;;  %p191_p5 = scmp.lt.s32.totalorder (!%p159_p3), %s403_s13, 1 }
   0x9   : > { %s508_s18 = smov (%p27_p4, %s506_s18), 0  ;;  %162 = sbr.rel (%p159_p3) target bundleno = 145 (0x91), region = 32 }
   0xa   : > { %p193_p6 = scmp.lt.s32.totalorder (!%p159_p3), %s327_s23, 3 }
   0xe   : > { %v212_v0 = vld [vmem:[%s496_s1] sm:$0xff]  ;;  %v417_v1 = vmov 0   ;;  %s510_s13 = smov (!%p191_p5, %s403_s13), 1  ;;  %s512_s23 = smov (!%p193_p6, %s327_s23), 3 }
   0xf   : > { %376 = vset.pattern.permute.xlu0 %v417_v1  ;;  %v220_v2 = vld [vmem:[%s497_s2] sm:$0xff]  ;;  %s328_s24 = sshll.u32 %s510_s13, 2 }
  0x10   : > { %215 = vperm.xlu0 %376, %v212_v0   ;;  %s196_s25 = sadd.s32 %s328_s24, %s512_s23 }
  0x11   : > { %s329_s26 = sshll.u32 %s196_s25, 3 }
  0x12   : > { %s198_s29 = scalar_lea.vmem %s495_s0, %s329_s26  ;;  %s208_s5 = scalar_lea.vmem %s498_s3, %s329_s26 }
  0x13   : > { %v210_v4 = vld [vmem:[%s198_s29] sm:$0xff]  ;;  %v211_v5 = vld [vmem:[%s198_s29 + $0x8] sm:$0xff] }
  0x18   : > { %223 = vperm.xlu0 %376, %v220_v2  }
  0x82   : > { %v216_v3 = vpop.permute.xlu0 %215 }
  0x83   : > { %v218_v6 = vmul.f32 %v216_v3, %v210_v4  ;;  %v219_v7 = vmul.f32 %v216_v3, %v211_v5 }
  0x8a   : > { %v224_v8 = vpop.permute.xlu0 %223 }
  0x8b   : > { %v226_v9 = vadd.f32 %v224_v8, %v218_v6  ;;  %v227_v10 = vadd.f32 %v224_v8, %v219_v7 }
  0x8d   : > { %v228_v11 = vmax.f32 %v226_v9, 0.0  ;;  %v229_v12 = vmax.f32 %v227_v10, 0.0 }
  0x8f   : > { %230 = vst [vmem:[%s208_s5] sm:$0xff] %v228_v11 }
  0x90   : > { %231 = vst [vmem:[%s208_s5 + $0x8] sm:$0xff] %v229_v12 }
  0x91 PF: > { %s13_s16 = sadd.s32 1, %s415_s16   ;;  %s499_s12 = smov %s407_s14 }
  0x92   : > { %p10_p7 = scmp.ge.s32.totalorder %s13_s16, 6   ;;  %s500_s13 = smov %s411_s15 }
  0x93   : > { %s501_s14 = smov %s504_s17  ;;  %s502_s15 = smov %s508_s18 }
  0x94   :  { %12 = sbr.rel (!%p10_p7) target bundleno = 3 (0x3), region = 62 }

</bundles_post_ra>
